<compile_context>
chip_gen: v7x
topology: tpu7x:2x2x1
jax: 0.10.0
libtpu: 0.0.40
codegen_flags: <defaults>
</compile_context>

<pallas_src>
import functools

import jax
import jax.numpy as jnp
from jax.experimental import pallas as pl
from jax.experimental.pallas import tpu as pltpu


def _round_up(x: int, m: int) -> int:
    return ((x + m - 1) // m) * m


def _grid_invariant_spec(block_shape, index_map):
    """BlockSpec for an operand whose index_map never changes across the grid.

    Single-buffer it when this JAX build supports pipeline_mode (halves the
    VMEM footprint of the resident weight slab); otherwise fall back to the
    default double-buffered spec.
    """
    buffered = getattr(pl, "Buffered", None)
    if buffered is not None:
        try:
            return pl.BlockSpec(block_shape, index_map,
                                pipeline_mode=buffered(buffer_count=1))
        except Exception:  # older/newer BlockSpec signature -> default spec
            pass
    return pl.BlockSpec(block_shape, index_map)


# ---------------------------------------------------------------------------
# Fused kernel: 5 x [Linear -> exact GELU (+ optional residual)].
# ---------------------------------------------------------------------------
def _fused_mlp_kernel(x_ref, w_ref, b_ref, o_ref, *,
                      residual_flags, d_in, d_pad, d_out):
    inv_sqrt2 = jnp.float32(0.7071067811865476)
    block_b = x_ref.shape[0]

    h = x_ref[...].astype(jnp.float32)                       # [block_b, d_in]
    if d_in < d_pad:
        # In-kernel lane pad to the 128-multiple working width.  Padded lanes
        # only ever meet zero weight rows / zero bias, and GELU(0)=0, so they
        # stay exactly zero through every layer.
        h = jnp.concatenate(
            [h, jnp.zeros((block_b, d_pad - d_in), jnp.float32)], axis=-1)

    # 5 fixed layers -> fully unrolled (LLO scheduler sees everything).
    for li, residual in enumerate(residual_flags):
        w = w_ref[li]                                        # [d_pad, d_pad] bf16
        b = b_ref[li]                                        # [1, d_pad]     f32
        # bf16 operands feed the MXU at native rate; accumulation stays f32.
        y = jnp.dot(h.astype(jnp.bfloat16), w,
                    preferred_element_type=jnp.float32) + b
        # Exact (erf) GELU, matching nn.GELU(); f32 VPU math (v5e-safe).
        # TODO(synk): switch to tanh-approx GELU (native EUP op, frees the
        # VALU slot) if the exact-erf semantics can be relaxed.
        g = 0.5 * y * (1.0 + jax.lax.erf(y * inv_sqrt2))
        h = h + g if residual else g

    # Store only the true output width (no XLA-side slice afterwards).
    o_ref[...] = h[:, :d_out].astype(o_ref.dtype)


def fused_mlp_forward(x, w_stack, b_stack, residual_flags, out_features,
                      *, block_b=None):
    """Run the fused 5-layer MLP.  x: [B, Din]; w_stack: [L, Dp, Dp] (bf16)."""
    B, d_in = x.shape
    L, d_pad, d_pad2 = w_stack.shape
    assert d_pad == d_pad2 and d_in <= d_pad and out_features <= d_pad

    # Batch tiling: multiple of 8 sublanes, capped at 128 rows (keeps peak
    # live vregs inside the register file), and aiming for >=2 grid steps so
    # v7x's second TensorCore gets work and DMAs overlap compute.
    Bp = _round_up(B, 8)
    if block_b is None:
        block_b = min(128, max(8, _round_up(max(Bp // 2, 1), 8)))
    else:
        block_b = _round_up(block_b, 8)
    Bp = _round_up(Bp, block_b)

    # Only pad the batch dim, and only when needed (no lane pad: the kernel
    # pads lanes itself).  For B already a tile multiple this is a no-op.
    if Bp != B:
        x_in = jnp.zeros((Bp, d_in), x.dtype).at[:B].set(x)
    else:
        x_in = x

    grid = (Bp // block_b,)
    kernel = functools.partial(
        _fused_mlp_kernel,
        residual_flags=tuple(residual_flags),
        d_in=d_in, d_pad=d_pad, d_out=out_features)

    out = pl.pallas_call(
        kernel,
        out_shape=jax.ShapeDtypeStruct((Bp, out_features), x.dtype),
        grid=grid,
        in_specs=[
            # x at its true feature width (== full array last dim -> legal).
            pl.BlockSpec((block_b, d_in), lambda i: (i, 0)),
            # Grid-invariant weight / bias slabs, single-buffered if possible.
            _grid_invariant_spec((L, d_pad, d_pad), lambda i: (0, 0, 0)),
            _grid_invariant_spec((L, 1, d_pad), lambda i: (0, 0, 0)),
        ],
        out_specs=pl.BlockSpec((block_b, out_features), lambda i: (i, 0)),
        compiler_params=pltpu.CompilerParams(
            dimension_semantics=("parallel",)),   # shards batch tiles across TCs
    )(x_in, w_stack, b_stack)

    return out if Bp == B else out[:B]


# ---------------------------------------------------------------------------
# Parameter construction (matches the PyTorch module's Linear layers).
# ---------------------------------------------------------------------------
def init_params(key, layer_sizes):
    """Deterministic init. Returns list of (W[in,out], b[out]) in f32."""
    params = []
    for li in range(5):
        din, dout = layer_sizes[li], layer_sizes[li + 1]
        key, kw, kb = jax.random.split(key, 3)
        # PyTorch Linear default: U(-1/sqrt(din), 1/sqrt(din)) for W and b.
        bound = 1.0 / jnp.sqrt(jnp.float32(din))
        w_pt = jax.random.uniform(kw, (dout, din), jnp.float32, -bound, bound)
        b_pt = jax.random.uniform(kb, (dout,), jnp.float32, -bound, bound)
        params.append((w_pt.T, b_pt))                 # store W as [in, out]
    return params


def pack_params(params, layer_sizes):
    """Zero-pad and stack params: w_stack [L,Dp,Dp] bf16, b_stack [L,1,Dp] f32."""
    d_pad = _round_up(max(layer_sizes), 128)
    # TODO(synk): on v6e/v7x pad to 256-multiples when max(layer_sizes) > 128
    # (256x256 MXU); keep 128-multiples on v5e.
    L = len(params)
    w_stack = jnp.zeros((L, d_pad, d_pad), jnp.float32)
    b_stack = jnp.zeros((L, 1, d_pad), jnp.float32)
    for li, (w, b) in enumerate(params):
        din, dout = w.shape
        w_stack = w_stack.at[li, :din, :dout].set(w)
        b_stack = b_stack.at[li, 0, :dout].set(b)
    return w_stack.astype(jnp.bfloat16), b_stack, d_pad


def example_deep_nn_forward(x, params, layer_sizes, use_shortcut: bool):
    """Full forward pass of ExampleDeepNeuralNetwork via one fused kernel."""
    w_stack, b_stack, _ = pack_params(params, layer_sizes)
    residual_flags = tuple(
        bool(use_shortcut and layer_sizes[li] == layer_sizes[li + 1])
        for li in range(5))
    return fused_mlp_forward(x, w_stack, b_stack, residual_flags,
                             out_features=layer_sizes[-1])


# ---------------------------------------------------------------------------
# Pure-JAX references for correctness checking.
# ---------------------------------------------------------------------------
def _ref_forward_f32(x, params, use_shortcut: bool):
    """Exact f32 reference (PyTorch semantics)."""
    for w, b in params:
        y = x @ w + b[None, :]
        g = 0.5 * y * (1.0 + jax.lax.erf(y * jnp.float32(0.7071067811865476)))
        x = x + g if (use_shortcut and x.shape == g.shape) else g
    return x


def _ref_forward_bf16_dot(x, params, use_shortcut: bool):
    """Numerics-matched reference: bf16 dot operands, f32 accumulation/GELU."""
    h = x.astype(jnp.float32)
    for w, b in params:
        y = jnp.dot(h.astype(jnp.bfloat16), w.astype(jnp.bfloat16),
                    preferred_element_type=jnp.float32) + b[None, :]
        g = 0.5 * y * (1.0 + jax.lax.erf(y * jnp.float32(0.7071067811865476)))
        h = h + g if (use_shortcut and h.shape == g.shape) else g
    return h


if __name__ == "__main__":
    key = jax.random.PRNGKey(0)
    # Small shapes consistent with the module: 5 Linear layers, hidden=32.
    layer_sizes = [32, 32, 32, 32, 32, 32]
    batch = 8

    key, kx, kp = jax.random.split(key, 3)
    x = jax.random.normal(kx, (batch, layer_sizes[0]), jnp.float32)
    params = init_params(kp, layer_sizes)

    use_shortcut = True  # exercise the residual path (shapes all match)

    out = example_deep_nn_forward(x, params, layer_sizes, use_shortcut)
    out = jax.block_until_ready(out)
    assert out.shape == (batch, layer_sizes[-1])

    # Tight check vs. a reference that uses the same bf16-operand matmul
    # numerics as the kernel (differences are accumulation-order only).
    ref_matched = _ref_forward_bf16_dot(x, params, use_shortcut)
    assert jnp.allclose(out, ref_matched, atol=1e-3, rtol=1e-3), (
        float(jnp.max(jnp.abs(out - ref_matched))))

    # Loose sanity check vs. the exact f32 reference (bf16 operand tolerance).
    ref_exact = _ref_forward_f32(x, params, use_shortcut)
    assert jnp.allclose(out, ref_exact, atol=5e-2, rtol=5e-2), (
        float(jnp.max(jnp.abs(out - ref_exact))))

    print("KERNEL_OK")
</pallas_src>

<mosaic_0001>
module attributes {stable_mosaic.version = 11 : i64} {
  func.func @_fused_mlp_kernel(%arg0: i32, %arg1: memref<8x32xf32, #tpu.memory_space<vmem>>, %arg2: memref<5x128x128xbf16, #tpu.memory_space<vmem>>, %arg3: memref<5x1x128xf32, #tpu.memory_space<vmem>>, %arg4: memref<8x32xf32, #tpu.memory_space<vmem>>) attributes {dimension_semantics = [#tpu.dimension_semantics<parallel>], iteration_bounds = array<i64: 1>, scalar_prefetch = 0 : i64, scratch_operands = 0 : i64, tpu.core_type = #tpu.core_type<tc>, window_params = [{transform_indices = @transform_0, window_bounds = array<i64: 8, 32>}, {pipeline_mode = #tpu.pipeline_mode<synchronous>, transform_indices = @transform_1, window_bounds = array<i64: 5, 128, 128>}, {pipeline_mode = #tpu.pipeline_mode<synchronous>, transform_indices = @transform_2, window_bounds = array<i64: 5, 1, 128>}, {transform_indices = @transform_3, window_bounds = array<i64: 8, 32>}]} {
    %c0 = arith.constant 0 : index
    %c0_0 = arith.constant 0 : index
    %0 = vector.load %arg1[%c0, %c0_0] : memref<8x32xf32, #tpu.memory_space<vmem>>, vector<8x32xf32>
    %cst = arith.constant 0.000000e+00 : f32
    %1 = vector.broadcast %cst : f32 to vector<8x96xf32>
    %2 = tpu.concatenate %0, %1 in 1 : vector<8x32xf32>, vector<8x96xf32> -> vector<8x128xf32>
    %c0_1 = arith.constant 0 : index
    %c0_2 = arith.constant 0 : index
    %c0_3 = arith.constant 0 : index
    %3 = vector.load %arg2[%c0_1, %c0_2, %c0_3] : memref<5x128x128xbf16, #tpu.memory_space<vmem>>, vector<1x128x128xbf16>
    %4 = vector.shape_cast %3 : vector<1x128x128xbf16> to vector<128x128xbf16>
    %c0_4 = arith.constant 0 : index
    %c0_5 = arith.constant 0 : index
    %c0_6 = arith.constant 0 : index
    %5 = vector.load %arg3[%c0_4, %c0_5, %c0_6] : memref<5x1x128xf32, #tpu.memory_space<vmem>>, vector<1x1x128xf32>
    %6 = vector.shape_cast %5 : vector<1x1x128xf32> to vector<1x128xf32>
    %7 = arith.truncf %2 : vector<8x128xf32> to vector<8x128xbf16>
    %cst_7 = arith.constant dense<0.000000e+00> : vector<8x128xf32>
    %8 = tpu.matmul %7, %4, %cst_7 {dimension_numbers = #tpu.dot_dimension_numbers<[1], [0], [0], [1], [0, 0, 1, 1], [], []>} : vector<8x128xbf16>, vector<128x128xbf16>, vector<8x128xf32> -> vector<8x128xf32>
    %9 = vector.broadcast %6 : vector<1x128xf32> to vector<8x128xf32>
    %10 = arith.addf %8, %9 : vector<8x128xf32>
    %cst_8 = arith.constant 5.000000e-01 : f32
    %11 = vector.broadcast %cst_8 : f32 to vector<8x128xf32>
    %12 = arith.mulf %11, %10 : vector<8x128xf32>
    %cst_9 = arith.constant 0.707106769 : f32
    %13 = vector.broadcast %cst_9 : f32 to vector<8x128xf32>
    %14 = arith.mulf %10, %13 : vector<8x128xf32>
    %15 = math.erf %14 : vector<8x128xf32>
    %cst_10 = arith.constant 1.000000e+00 : f32
    %16 = vector.broadcast %cst_10 : f32 to vector<8x128xf32>
    %17 = arith.addf %16, %15 : vector<8x128xf32>
    %18 = arith.mulf %12, %17 : vector<8x128xf32>
    %19 = arith.addf %2, %18 : vector<8x128xf32>
    %c1 = arith.constant 1 : index
    %c0_11 = arith.constant 0 : index
    %c0_12 = arith.constant 0 : index
    %20 = vector.load %arg2[%c1, %c0_11, %c0_12] : memref<5x128x128xbf16, #tpu.memory_space<vmem>>, vector<1x128x128xbf16>
    %21 = vector.shape_cast %20 : vector<1x128x128xbf16> to vector<128x128xbf16>
    %c1_13 = arith.constant 1 : index
    %c0_14 = arith.constant 0 : index
    %c0_15 = arith.constant 0 : index
    %22 = vector.load %arg3[%c1_13, %c0_14, %c0_15] : memref<5x1x128xf32, #tpu.memory_space<vmem>>, vector<1x1x128xf32>
    %23 = vector.shape_cast %22 : vector<1x1x128xf32> to vector<1x128xf32>
    %24 = arith.truncf %19 : vector<8x128xf32> to vector<8x128xbf16>
    %cst_16 = arith.constant dense<0.000000e+00> : vector<8x128xf32>
    %25 = tpu.matmul %24, %21, %cst_16 {dimension_numbers = #tpu.dot_dimension_numbers<[1], [0], [0], [1], [0, 0, 1, 1], [], []>} : vector<8x128xbf16>, vector<128x128xbf16>, vector<8x128xf32> -> vector<8x128xf32>
    %26 = vector.broadcast %23 : vector<1x128xf32> to vector<8x128xf32>
    %27 = arith.addf %25, %26 : vector<8x128xf32>
    %cst_17 = arith.constant 5.000000e-01 : f32
    %28 = vector.broadcast %cst_17 : f32 to vector<8x128xf32>
    %29 = arith.mulf %28, %27 : vector<8x128xf32>
    %cst_18 = arith.constant 0.707106769 : f32
    %30 = vector.broadcast %cst_18 : f32 to vector<8x128xf32>
    %31 = arith.mulf %27, %30 : vector<8x128xf32>
    %32 = math.erf %31 : vector<8x128xf32>
    %cst_19 = arith.constant 1.000000e+00 : f32
    %33 = vector.broadcast %cst_19 : f32 to vector<8x128xf32>
    %34 = arith.addf %33, %32 : vector<8x128xf32>
    %35 = arith.mulf %29, %34 : vector<8x128xf32>
    %36 = arith.addf %19, %35 : vector<8x128xf32>
    %c2 = arith.constant 2 : index
    %c0_20 = arith.constant 0 : index
    %c0_21 = arith.constant 0 : index
    %37 = vector.load %arg2[%c2, %c0_20, %c0_21] : memref<5x128x128xbf16, #tpu.memory_space<vmem>>, vector<1x128x128xbf16>
    %38 = vector.shape_cast %37 : vector<1x128x128xbf16> to vector<128x128xbf16>
    %c2_22 = arith.constant 2 : index
    %c0_23 = arith.constant 0 : index
    %c0_24 = arith.constant 0 : index
    %39 = vector.load %arg3[%c2_22, %c0_23, %c0_24] : memref<5x1x128xf32, #tpu.memory_space<vmem>>, vector<1x1x128xf32>
    %40 = vector.shape_cast %39 : vector<1x1x128xf32> to vector<1x128xf32>
    %41 = arith.truncf %36 : vector<8x128xf32> to vector<8x128xbf16>
    %cst_25 = arith.constant dense<0.000000e+00> : vector<8x128xf32>
    %42 = tpu.matmul %41, %38, %cst_25 {dimension_numbers = #tpu.dot_dimension_numbers<[1], [0], [0], [1], [0, 0, 1, 1], [], []>} : vector<8x128xbf16>, vector<128x128xbf16>, vector<8x128xf32> -> vector<8x128xf32>
    %43 = vector.broadcast %40 : vector<1x128xf32> to vector<8x128xf32>
    %44 = arith.addf %42, %43 : vector<8x128xf32>
    %cst_26 = arith.constant 5.000000e-01 : f32
    %45 = vector.broadcast %cst_26 : f32 to vector<8x128xf32>
    %46 = arith.mulf %45, %44 : vector<8x128xf32>
    %cst_27 = arith.constant 0.707106769 : f32
    %47 = vector.broadcast %cst_27 : f32 to vector<8x128xf32>
    %48 = arith.mulf %44, %47 : vector<8x128xf32>
    %49 = math.erf %48 : vector<8x128xf32>
    %cst_28 = arith.constant 1.000000e+00 : f32
    %50 = vector.broadcast %cst_28 : f32 to vector<8x128xf32>
    %51 = arith.addf %50, %49 : vector<8x128xf32>
    %52 = arith.mulf %46, %51 : vector<8x128xf32>
    %53 = arith.addf %36, %52 : vector<8x128xf32>
    %c3 = arith.constant 3 : index
    %c0_29 = arith.constant 0 : index
    %c0_30 = arith.constant 0 : index
    %54 = vector.load %arg2[%c3, %c0_29, %c0_30] : memref<5x128x128xbf16, #tpu.memory_space<vmem>>, vector<1x128x128xbf16>
    %55 = vector.shape_cast %54 : vector<1x128x128xbf16> to vector<128x128xbf16>
    %c3_31 = arith.constant 3 : index
    %c0_32 = arith.constant 0 : index
    %c0_33 = arith.constant 0 : index
    %56 = vector.load %arg3[%c3_31, %c0_32, %c0_33] : memref<5x1x128xf32, #tpu.memory_space<vmem>>, vector<1x1x128xf32>
    %57 = vector.shape_cast %56 : vector<1x1x128xf32> to vector<1x128xf32>
    %58 = arith.truncf %53 : vector<8x128xf32> to vector<8x128xbf16>
    %cst_34 = arith.constant dense<0.000000e+00> : vector<8x128xf32>
    %59 = tpu.matmul %58, %55, %cst_34 {dimension_numbers = #tpu.dot_dimension_numbers<[1], [0], [0], [1], [0, 0, 1, 1], [], []>} : vector<8x128xbf16>, vector<128x128xbf16>, vector<8x128xf32> -> vector<8x128xf32>
    %60 = vector.broadcast %57 : vector<1x128xf32> to vector<8x128xf32>
    %61 = arith.addf %59, %60 : vector<8x128xf32>
    %cst_35 = arith.constant 5.000000e-01 : f32
    %62 = vector.broadcast %cst_35 : f32 to vector<8x128xf32>
    %63 = arith.mulf %62, %61 : vector<8x128xf32>
    %cst_36 = arith.constant 0.707106769 : f32
    %64 = vector.broadcast %cst_36 : f32 to vector<8x128xf32>
    %65 = arith.mulf %61, %64 : vector<8x128xf32>
    %66 = math.erf %65 : vector<8x128xf32>
    %cst_37 = arith.constant 1.000000e+00 : f32
    %67 = vector.broadcast %cst_37 : f32 to vector<8x128xf32>
    %68 = arith.addf %67, %66 : vector<8x128xf32>
    %69 = arith.mulf %63, %68 : vector<8x128xf32>
    %70 = arith.addf %53, %69 : vector<8x128xf32>
    %c4 = arith.constant 4 : index
    %c0_38 = arith.constant 0 : index
    %c0_39 = arith.constant 0 : index
    %71 = vector.load %arg2[%c4, %c0_38, %c0_39] : memref<5x128x128xbf16, #tpu.memory_space<vmem>>, vector<1x128x128xbf16>
    %72 = vector.shape_cast %71 : vector<1x128x128xbf16> to vector<128x128xbf16>
    %c4_40 = arith.constant 4 : index
    %c0_41 = arith.constant 0 : index
    %c0_42 = arith.constant 0 : index
    %73 = vector.load %arg3[%c4_40, %c0_41, %c0_42] : memref<5x1x128xf32, #tpu.memory_space<vmem>>, vector<1x1x128xf32>
    %74 = vector.shape_cast %73 : vector<1x1x128xf32> to vector<1x128xf32>
    %75 = arith.truncf %70 : vector<8x128xf32> to vector<8x128xbf16>
    %cst_43 = arith.constant dense<0.000000e+00> : vector<8x128xf32>
    %76 = tpu.matmul %75, %72, %cst_43 {dimension_numbers = #tpu.dot_dimension_numbers<[1], [0], [0], [1], [0, 0, 1, 1], [], []>} : vector<8x128xbf16>, vector<128x128xbf16>, vector<8x128xf32> -> vector<8x128xf32>
    %77 = vector.broadcast %74 : vector<1x128xf32> to vector<8x128xf32>
    %78 = arith.addf %76, %77 : vector<8x128xf32>
    %cst_44 = arith.constant 5.000000e-01 : f32
    %79 = vector.broadcast %cst_44 : f32 to vector<8x128xf32>
    %80 = arith.mulf %79, %78 : vector<8x128xf32>
    %cst_45 = arith.constant 0.707106769 : f32
    %81 = vector.broadcast %cst_45 : f32 to vector<8x128xf32>
    %82 = arith.mulf %78, %81 : vector<8x128xf32>
    %83 = math.erf %82 : vector<8x128xf32>
    %cst_46 = arith.constant 1.000000e+00 : f32
    %84 = vector.broadcast %cst_46 : f32 to vector<8x128xf32>
    %85 = arith.addf %84, %83 : vector<8x128xf32>
    %86 = arith.mulf %80, %85 : vector<8x128xf32>
    %87 = arith.addf %70, %86 : vector<8x128xf32>
    %88 = vector.extract_strided_slice %87 {offsets = [0, 0], sizes = [8, 32], strides = [1, 1]} : vector<8x128xf32> to vector<8x32xf32>
    %c0_47 = arith.constant 0 : index
    %c0_48 = arith.constant 0 : index
    %89 = vector.load %arg4[%c0_47, %c0_48] : memref<8x32xf32, #tpu.memory_space<vmem>>, vector<8x32xf32>
    tpu.vector_store %arg4[%c0_47, %c0_48], %88 {strides = array<i32>} : memref<8x32xf32, #tpu.memory_space<vmem>>, vector<8x32xf32>,
    return
  }
  func.func @transform_0(%arg0: i32) -> (i32, i32) {
    %c0_i32 = arith.constant 0 : i32
    %c0_i32_0 = arith.constant 0 : i32
    return %arg0, %c0_i32 : i32, i32
  }
  func.func @transform_1(%arg0: i32) -> (i32, i32, i32) {
    %c0_i32 = arith.constant 0 : i32
    %c0_i32_0 = arith.constant 0 : i32
    %c0_i32_1 = arith.constant 0 : i32
    %c0_i32_2 = arith.constant 0 : i32
    return %c0_i32, %c0_i32_0, %c0_i32_1 : i32, i32, i32
  }
  func.func @transform_2(%arg0: i32) -> (i32, i32, i32) {
    %c0_i32 = arith.constant 0 : i32
    %c0_i32_0 = arith.constant 0 : i32
    %c0_i32_1 = arith.constant 0 : i32
    %c0_i32_2 = arith.constant 0 : i32
    return %c0_i32, %c0_i32_0, %c0_i32_1 : i32, i32, i32
  }
  func.func @transform_3(%arg0: i32) -> (i32, i32) {
    %c0_i32 = arith.constant 0 : i32
    %c0_i32_0 = arith.constant 0 : i32
    return %arg0, %c0_i32 : i32, i32
  }
}

</mosaic_0001>

<bundles_post_ra>
// kernel: tpu_custom_call.1
= control target key start
LH: loop header
LB: loop body
LE: loop exit
PB: predicated region body
PF: predicated region fallthrough
CT: control target
= control target key end

     0   :  { %8 = vsyncpa [#allocation3], 0  ;;  %s1125_s0 = inlined_call_operand.hbm [shape: f32[8,32], index: 0, kind: input, shape index: {}]   ;;  %s1126_s1 = inlined_call_operand.hbm [shape: bf16[5,128,128], index: 1, kind: input, shape index: {}]   ;;  %s1127_s2 = inlined_call_operand.vmem [shape: f32[5,1,128], index: 2, kind: input, shape index: {}]   ;;  %s1128_s3 = inlined_call_operand.hbm [shape: f32[8,32], index: 3, kind: output, shape index: {}]  }
   0x1   :  { %9 = vsyncpa [#allocation6], 0 }
   0x2   :  { %10 = vsyncpa [#allocation4], 0  ;;  %s986_s12 = smov [#allocation2]   ;;  %s987_s14 = smov [#allocation5]  }
   0x3   :  { %s17_s13 = sshll.u32 %s986_s12, 4  ;;  %s26_s15 = sshll.u32 %s987_s14, 4  ;;  %s18_s13 = int_to_ptr.vmem [resolvable:$true] %s17_s13  ;;  %s1013_s15 = int_to_ptr.vmem [resolvable:$true] %s26_s15 }
   0x4   :  { %s914_s18 = scalar_lea.hbm %s1125_s0, 128 }
   0x5   :  { %p915_p0 = scmp.ne.s32.totalorder %s1125_s0, %s914_s18  ;;  %p918_p1 = scmp.lt.u32.totalorder %s914_s18, %s1125_s0 }
   0x7   :  { %p920_p2 = pnand %p918_p1, %p915_p0 }
   0x9   :  { %923 = shalt.err (!%p920_p2)
}
   0xa   :  { %s924_s23 = scalar_lea.vmem %s18_s13, 128  ;;  %p929_p4 = scmp.lt.s32.totalorder %s18_s13, %s18_s13 }
   0xb   :  { %p925_p3 = scmp.ne.s32.totalorder %s18_s13, %s924_s23  ;;  %p930_p5 = scmp.lt.s32.totalorder %s924_s23, %s924_s23 }
   0xd   :  { %p931_p6 = por %p930_p5, %p929_p4 }
   0xf   :  { %p932_p7 = pnand %p931_p6, %p925_p3 }
  0x11   :  { %935 = shalt.err (!%p932_p7)
}
  0x12   :  { %20 = dma.hbm_to_vmem [thread:$0]  %s1125_s0, 128, %s18_s13, [#allocation3]  }
  0x13   :  { %s936_s28 = scalar_lea.hbm %s1126_s1, 5120 }
  0x14   :  { %p937_p8 = scmp.ne.s32.totalorder %s1126_s1, %s936_s28  ;;  %p940_p9 = scmp.lt.u32.totalorder %s936_s28, %s1126_s1 }
  0x16   :  { %p942_p10 = pnand %p940_p9, %p937_p8 }
  0x18   :  { %945 = shalt.err (!%p942_p10)
}
  0x19   :  { %s946_s6 = scalar_lea.vmem %s1013_s15, 5120  ;;  %p951_p12 = scmp.lt.s32.totalorder %s1013_s15, %s1013_s15 }
  0x1a   :  { %p947_p11 = scmp.ne.s32.totalorder %s1013_s15, %s946_s6  ;;  %p952_p13 = scmp.lt.s32.totalorder %s946_s6, %s946_s6 }
  0x1c   :  { %p953_p0 = por %p952_p13, %p951_p12 }
  0x1e   :  { %p954_p1 = pnand %p953_p0, %p947_p11 }
  0x20   :  { %957 = shalt.err (!%p954_p1)
}
  0x21   :  { %s988_s0 = smov 64   ;;  %s989_s7 = smov 4  }
  0x22   :  { %32 = dma.hbm_to_vmem [thread:$0]  %s1126_s1, 5120, %s1013_s15, [#allocation6], %s988_s0, %s988_s0, %s989_s7  }
  0x23   :  { %980 = dma.done.wait [#allocation3], 128  }
  0x24   :  { %981 = vsyncadd [#allocation3], 4294967168 }
  0x25   :  { %982 = dma.done.wait [#allocation6], 5120  }
  0x26   :  { %983 = vsyncadd [#allocation6], 4294962176  ;;  %v990_v0 = vmov 0.0   ;;  %vm991_vm0 = vmmov 0   ;;  %v864_v1 = vld [vmem:[#allocation5] sm:$0xff]   ;;  %v865_v2 = vld [vmem:[#allocation5 + $0x8] sm:$0xff]  }
  0x27   :  { %757 = vmatprep.subr.bf16.mxu0 %v990_v0  ;;  %773 = vmatprep.mubr.msk.bf16.mxu0 %vm991_vm0, %v990_v0  ;;  %v866_v3 = vld [vmem:[#allocation5 + $0x10] sm:$0xff]   ;;  %v872_v4 = vld [vmem:[#allocation5 + $0x40] sm:$0xff]   ;;  %v867_v5 = vld [vmem:[#allocation5 + $0x18] sm:$0xff]   ;;  %vm43_vm1 = vcmask 261120   ;;  %s992_s19 = smov [#allocation7]  }
  0x28   :  { %777 = vmatprep.subr.bf16.mxu1 %v990_v0  ;;  %793 = vmatprep.mubr.msk.bf16.mxu1 %vm991_vm0, %v990_v0  ;;  %v873_v6 = vld [vmem:[#allocation5 + $0x48] sm:$0xff]   ;;  %v868_v7 = vld [vmem:[#allocation5 + $0x20] sm:$0xff]   ;;  %v870_v9 = vld [vmem:[#allocation5 + $0x30] sm:$0xff]   ;;  %s650_s20 = sshll.u32 %s992_s19, 4  ;;  %s651_s20 = int_to_ptr.vmem [resolvable:$true] %s650_s20 }
  0x29   :  { %758 = vmatpush3.bf16.msra.mxu0 %v864_v1  ;;  %778 = vmatpush3.bf16.msra.mxu1 %v872_v4  ;;  %v869_v8 = vld [vmem:[#allocation5 + $0x28] sm:$0xff]   ;;  %v871_v10 = vld [vmem:[#allocation5 + $0x38] sm:$0xff]   ;;  %vm669_vm2 = vmpackc.low %vm43_vm1, %vm43_vm1  ;;  %s958_s21 = scalar_lea.vmem %s651_s20, 128  ;;  %p963_p3 = scmp.lt.s32.totalorder %s651_s20, %s651_s20 }
  0x2a   :  { %759 = vmatprep.subr.bf16.mxu0 %v990_v0  ;;  %779 = vmatprep.subr.bf16.mxu1 %v990_v0  ;;  %v42_v11 = vld [vmem:[#allocation2] sm:$0xff]  ;;  %v874_v13 = vld [vmem:[#allocation5 + $0x50] sm:$0xff]   ;;  %v876_v15 = vld [vmem:[#allocation5 + $0x60] sm:$0xff]   ;;  %p959_p2 = scmp.ne.s32.totalorder %s651_s20, %s958_s21  ;;  %p964_p4 = scmp.lt.s32.totalorder %s958_s21, %s958_s21 }
  0x2b   :  { %v670_v12 = vpack.c.bf16 %v42_v11, %v42_v11  ;;  %v875_v14 = vld [vmem:[#allocation5 + $0x58] sm:$0xff]   ;;  %v877_v16 = vld [vmem:[#allocation5 + $0x68] sm:$0xff]   ;;  %v878_v17 = vld [vmem:[#allocation5 + $0x70] sm:$0xff]   ;;  %v44_v31 = vsel %vm43_vm1, %v42_v11, 0.0 }
  0x2c   :  { %v879_v18 = vld [vmem:[#allocation5 + $0x78] sm:$0xff]   ;;  %v880_v19 = vld [vmem:[#allocation5 + $0x80] sm:$0xff]   ;;  %v881_v20 = vld [vmem:[#allocation5 + $0x88] sm:$0xff]   ;;  %p965_p5 = por %p964_p4, %p963_p3 }
  0x2d   :  { %760 = vmatpush3.bf16.msra.mxu0 %v865_v2  ;;  %780 = vmatpush3.bf16.msra.mxu1 %v873_v6  ;;  %v660_v21 = vld [vmem:[%s1127_s2] ss:$0 sm:$0xff]  ;;  %v882_v35 = vld [vmem:[#allocation5 + $0x90] sm:$0xff]   ;;  %v884_v37 = vld [vmem:[#allocation5 + $0xa0] sm:$0xff]  }
  0x2e   :  { %761 = vmatprep.subr.bf16.mxu0 %v990_v0  ;;  %781 = vmatprep.subr.bf16.mxu1 %v990_v0  ;;  %v883_v36 = vld [vmem:[#allocation5 + $0x98] sm:$0xff]   ;;  %v885_v38 = vld [vmem:[#allocation5 + $0xa8] sm:$0xff]   ;;  %v886_v39 = vld [vmem:[#allocation5 + $0xb0] sm:$0xff]   ;;  %p966_p6 = pnand %p965_p5, %p959_p2 }
  0x2f   :  { %v887_v40 = vld [vmem:[#allocation5 + $0xb8] sm:$0xff]   ;;  %v888_v41 = vld [vmem:[#allocation5 + $0xc0] sm:$0xff]   ;;  %v889_v42 = vld [vmem:[#allocation5 + $0xc8] sm:$0xff]  }
  0x30   :  { %v673_v43 = vld [vmem:[%s1127_s2 + $0x1] ss:$0 sm:$0xff]  ;;  %v890_v56 = vld [vmem:[#allocation5 + $0xd0] sm:$0xff]   ;;  %v892_v58 = vld [vmem:[#allocation5 + $0xe0] sm:$0xff]  }
  0x31   :  { %762 = vmatpush3.bf16.msra.mxu0 %v866_v3  ;;  %782 = vmatpush3.bf16.msra.mxu1 %v874_v13  ;;  %v891_v57 = vld [vmem:[#allocation5 + $0xd8] sm:$0xff]   ;;  %v893_v59 = vld [vmem:[#allocation5 + $0xe8] sm:$0xff]   ;;  %v894_v60 = vld [vmem:[#allocation5 + $0xf0] sm:$0xff]  }
  0x32   :  { %763 = vmatprep.subr.bf16.mxu0 %v990_v0  ;;  %783 = vmatprep.subr.bf16.mxu1 %v990_v0  ;;  %v895_v61 = vld [vmem:[#allocation5 + $0xf8] sm:$0xff]   ;;  %v896_v62 = vld [vmem:[#allocation5 + $0x100] sm:$0xff]   ;;  %v897_v63 = vld [vmem:[#allocation5 + $0x108] sm:$0xff]  }
  0x33   :  { %v683_v1 = vld [vmem:[%s1127_s2 + $0x2] ss:$0 sm:$0xff] }
  0x35   :  { %764 = vmatpush3.bf16.msra.mxu0 %v867_v5  ;;  %784 = vmatpush3.bf16.msra.mxu1 %v875_v14  ;;  %v898_v14 = vld [vmem:[#allocation5 + $0x110] sm:$0xff]  }
  0x36   :  { %765 = vmatprep.subr.bf16.mxu0 %v990_v0  ;;  %785 = vmatprep.subr.bf16.mxu1 %v990_v0 }
  0x39   :  { %766 = vmatpush3.bf16.msra.mxu0 %v868_v7  ;;  %786 = vmatpush3.bf16.msra.mxu1 %v876_v15  ;;  %v899_v15 = vld [vmem:[#allocation5 + $0x118] sm:$0xff]  }
  0x3a   :  { %767 = vmatprep.subr.bf16.mxu0 %v990_v0  ;;  %787 = vmatprep.subr.bf16.mxu1 %v990_v0 }
  0x3d   :  { %768 = vmatpush3.bf16.msra.mxu0 %v869_v8  ;;  %788 = vmatpush3.bf16.msra.mxu1 %v877_v16  ;;  %v900_v16 = vld [vmem:[#allocation5 + $0x120] sm:$0xff]  }
  0x3e   :  { %769 = vmatprep.subr.bf16.mxu0 %v990_v0  ;;  %789 = vmatprep.subr.bf16.mxu1 %v990_v0 }
  0x41   :  { %770 = vmatpush3.bf16.msra.mxu0 %v870_v9  ;;  %790 = vmatpush3.bf16.msra.mxu1 %v878_v17  ;;  %v901_v17 = vld [vmem:[#allocation5 + $0x128] sm:$0xff]  }
  0x42   :  { %771 = vmatprep.subr.bf16.mxu0 %v990_v0  ;;  %791 = vmatprep.subr.bf16.mxu1 %v990_v0 }
  0x45   :  { %772 = vmatpush3.bf16.msra.mxu0 %v871_v10  ;;  %792 = vmatpush3.bf16.msra.mxu1 %v879_v18  ;;  %v902_v18 = vld [vmem:[#allocation5 + $0x130] sm:$0xff]  }
  0x46   :  { %797 = vmatprep.subr.bf16.mxu0 %v990_v0  ;;  %817 = vmatprep.subr.bf16.mxu1 %v990_v0 }
  0x48   :  { %774 = vmatmul.mubr.msk.bf16.vlgmr.msra.gmra.mrb[0].mxu0 %vm669_vm2, %v670_v12 }
  0x49   :  { %813 = vmatprep.mubr.msk.bf16.mxu0 %vm991_vm0, %v990_v0  ;;  %798 = vmatpush3.bf16.msra.mxu0 %v880_v19  ;;  %v903_v19 = vld [vmem:[#allocation5 + $0x138] sm:$0xff]  }
  0x4a   :  { %799 = vmatprep.subr.bf16.mxu0 %v990_v0 }
  0x4d   :  { %800 = vmatpush3.bf16.msra.mxu0 %v881_v20  ;;  %v693_v20 = vld [vmem:[%s1127_s2 + $0x3] ss:$0 sm:$0xff] }
  0x4e   :  { %801 = vmatprep.subr.bf16.mxu0 %v990_v0 }
  0x51   :  { %802 = vmatpush3.bf16.msra.mxu0 %v882_v35 }
  0x52   :  { %803 = vmatprep.subr.bf16.mxu0 %v990_v0 }
  0x55   :  { %804 = vmatpush3.bf16.msra.mxu0 %v883_v36 }
  0x56   :  { %805 = vmatprep.subr.bf16.mxu0 %v990_v0 }
  0x59   :  { %806 = vmatpush3.bf16.msra.mxu0 %v884_v37 }
  0x5a   :  { %807 = vmatprep.subr.bf16.mxu0 %v990_v0 }
  0x5d   :  { %808 = vmatpush3.bf16.msra.mxu0 %v885_v38 }
  0x5e   :  { %809 = vmatprep.subr.bf16.mxu0 %v990_v0 }
  0x61   :  { %810 = vmatpush3.bf16.msra.mxu0 %v886_v39 }
  0x62   :  { %811 = vmatprep.subr.bf16.mxu0 %v990_v0 }
  0x65   :  { %812 = vmatpush3.bf16.msra.mxu0 %v887_v40 }
  0x66   :  { %837 = vmatprep.subr.bf16.mxu0 %v990_v0 }
 0x11b   :  { %v151_v22 = vpop.f32.mrb[0].mxu0 }
 0x11c   :  { %v152_v23 = vadd.f32 %v660_v21, %v151_v22  ;;  %v775_v24 = vpop.f32.mrb[1].mxu0 }
 0x11d   :  { %v154_v25 = vpop.f32.mrb[2].mxu0 }
 0x11e   :  { %v158_v26 = vmul.f32 0.70710677, %v152_v23  ;;  %v776_v27 = vpop.f32.mrb[3].mxu0  ;;  %v157_v29 = vmul.f32 0.5, %v152_v23 }
 0x120   :  { %904 = verf.f32 %v158_v26 }
 0x12a   :  { %v905_v28 = vpop.eup %904 }
 0x12b   :  { %v160_v30 = vadd.f32 1.0, %v905_v28 }
 0x12d   :  { %v161_v32 = vmul.f32 %v160_v30, %v157_v29 }
 0x12f   :  { %v162_v33 = vadd.f32 %v161_v32, %v44_v31 }
 0x131   :  { %v182_v34 = vpack.c.bf16 %v162_v33, %v162_v33 }
 0x133   :  { %794 = vmatmul.mubr.bf16.vlgmr.msra.gmra.mrb[0].mxu1 %v182_v34 }
 0x134   :  { %833 = vmatprep.mubr.msk.bf16.mxu1 %vm991_vm0, %v990_v0  ;;  %818 = vmatpush3.bf16.msra.mxu1 %v888_v41 }
 0x135   :  { %819 = vmatprep.subr.bf16.mxu1 %v990_v0 }
 0x138   :  { %820 = vmatpush3.bf16.msra.mxu1 %v889_v42 }
 0x139   :  { %821 = vmatprep.subr.bf16.mxu1 %v990_v0 }
 0x13c   :  { %822 = vmatpush3.bf16.msra.mxu1 %v890_v56 }
 0x13d   :  { %823 = vmatprep.subr.bf16.mxu1 %v990_v0 }
 0x140   :  { %824 = vmatpush3.bf16.msra.mxu1 %v891_v57 }
 0x141   :  { %825 = vmatprep.subr.bf16.mxu1 %v990_v0 }
 0x144   :  { %826 = vmatpush3.bf16.msra.mxu1 %v892_v58 }
 0x145   :  { %827 = vmatprep.subr.bf16.mxu1 %v990_v0 }
 0x148   :  { %828 = vmatpush3.bf16.msra.mxu1 %v893_v59 }
 0x149   :  { %829 = vmatprep.subr.bf16.mxu1 %v990_v0 }
 0x14c   :  { %830 = vmatpush3.bf16.msra.mxu1 %v894_v60 }
 0x14d   :  { %831 = vmatprep.subr.bf16.mxu1 %v990_v0 }
 0x150   :  { %832 = vmatpush3.bf16.msra.mxu1 %v895_v61 }
 0x206   :  { %v271_v44 = vpop.f32.mrb[0].mxu1 }
 0x207   :  { %v272_v45 = vadd.f32 %v673_v43, %v271_v44  ;;  %v795_v46 = vpop.f32.mrb[1].mxu1 }
 0x208   :  { %v274_v47 = vpop.f32.mrb[2].mxu1 }
 0x209   :  { %v278_v48 = vmul.f32 0.70710677, %v272_v45  ;;  %v796_v49 = vpop.f32.mrb[3].mxu1  ;;  %v277_v51 = vmul.f32 0.5, %v272_v45 }
 0x20b   :  { %906 = verf.f32 %v278_v48 }
 0x215   :  { %v907_v50 = vpop.eup %906 }
 0x216   :  { %v280_v52 = vadd.f32 1.0, %v907_v50 }
 0x218   :  { %v281_v53 = vmul.f32 %v280_v52, %v277_v51 }
 0x21a   :  { %v282_v54 = vadd.f32 %v281_v53, %v162_v33 }
 0x21c   :  { %v302_v55 = vpack.c.bf16 %v282_v54, %v282_v54 }
 0x21e   :  { %814 = vmatmul.mubr.bf16.vlgmr.msra.gmra.mrb[4].mxu0 %v302_v55 }
 0x21f   :  { %853 = vmatprep.mubr.msk.bf16.mxu0 %vm991_vm0, %v990_v0  ;;  %838 = vmatpush3.bf16.msra.mxu0 %v896_v62 }
 0x220   :  { %839 = vmatprep.subr.bf16.mxu0 %v990_v0 }
 0x223   :  { %840 = vmatpush3.bf16.msra.mxu0 %v897_v63 }
 0x224   :  { %841 = vmatprep.subr.bf16.mxu0 %v990_v0 }
 0x227   :  { %842 = vmatpush3.bf16.msra.mxu0 %v898_v14 }
 0x228   :  { %843 = vmatprep.subr.bf16.mxu0 %v990_v0 }
 0x22b   :  { %844 = vmatpush3.bf16.msra.mxu0 %v899_v15 }
 0x22c   :  { %845 = vmatprep.subr.bf16.mxu0 %v990_v0 }
 0x22f   :  { %846 = vmatpush3.bf16.msra.mxu0 %v900_v16 }
 0x230   :  { %847 = vmatprep.subr.bf16.mxu0 %v990_v0 }
 0x233   :  { %848 = vmatpush3.bf16.msra.mxu0 %v901_v17 }
 0x234   :  { %849 = vmatprep.subr.bf16.mxu0 %v990_v0 }
 0x237   :  { %850 = vmatpush3.bf16.msra.mxu0 %v902_v18 }
 0x238   :  { %851 = vmatprep.subr.bf16.mxu0 %v990_v0  ;;  %v703_v0 = vld [vmem:[%s1127_s2 + $0x4] ss:$0 sm:$0xff] }
 0x23b   :  { %852 = vmatpush3.bf16.msra.mxu0 %v903_v19 }
 0x2f1   :  { %v391_v2 = vpop.f32.mrb[4].mxu0 }
 0x2f2   :  { %v392_v3 = vadd.f32 %v683_v1, %v391_v2  ;;  %v815_v4 = vpop.f32.mrb[5].mxu0 }
 0x2f3   :  { %v394_v5 = vpop.f32.mrb[6].mxu0 }
 0x2f4   :  { %v398_v6 = vmul.f32 0.70710677, %v392_v3  ;;  %v816_v7 = vpop.f32.mrb[7].mxu0  ;;  %v397_v9 = vmul.f32 0.5, %v392_v3 }
 0x2f6   :  { %908 = verf.f32 %v398_v6 }
 0x300   :  { %v909_v8 = vpop.eup %908 }
 0x301   :  { %v400_v10 = vadd.f32 1.0, %v909_v8 }
 0x303   :  { %v401_v11 = vmul.f32 %v400_v10, %v397_v9 }
 0x305   :  { %v402_v12 = vadd.f32 %v401_v11, %v282_v54 }
 0x307   :  { %v422_v13 = vpack.c.bf16 %v402_v12, %v402_v12 }
 0x309   :  { %834 = vmatmul.mubr.bf16.vlgmr.msra.gmra.mrb[4].mxu1 %v422_v13 }
 0x3dc   :  { %v511_v21 = vpop.f32.mrb[4].mxu1 }
 0x3dd   :  { %v512_v22 = vadd.f32 %v693_v20, %v511_v21  ;;  %v835_v23 = vpop.f32.mrb[5].mxu1 }
 0x3de   :  { %v514_v24 = vpop.f32.mrb[6].mxu1 }
 0x3df   :  { %v518_v25 = vmul.f32 0.70710677, %v512_v22  ;;  %v836_v26 = vpop.f32.mrb[7].mxu1  ;;  %v517_v28 = vmul.f32 0.5, %v512_v22 }
 0x3e1   :  { %910 = verf.f32 %v518_v25 }
 0x3eb   :  { %v911_v27 = vpop.eup %910 }
 0x3ec   :  { %v520_v29 = vadd.f32 1.0, %v911_v27 }
 0x3ee   :  { %v521_v30 = vmul.f32 %v520_v29, %v517_v28 }
 0x3f0   :  { %v522_v31 = vadd.f32 %v521_v30, %v402_v12 }
 0x3f2   :  { %v542_v32 = vpack.c.bf16 %v522_v31, %v522_v31 }
 0x3f4   :  { %854 = vmatmul.mubr.bf16.vlgmr.msra.gmra.mrb[8].mxu0 %v542_v32 }
 0x4c7   :  { %v631_v33 = vpop.f32.mrb[8].mxu0 }
 0x4c8   :  { %v632_v34 = vadd.f32 %v703_v0, %v631_v33  ;;  %v855_v35 = vpop.f32.mrb[9].mxu0 }
 0x4c9   :  { %v634_v36 = vpop.f32.mrb[10].mxu0 }
 0x4ca   :  { %v638_v37 = vmul.f32 0.70710677, %v632_v34  ;;  %v856_v38 = vpop.f32.mrb[11].mxu0  ;;  %v637_v40 = vmul.f32 0.5, %v632_v34 }
 0x4cc   :  { %912 = verf.f32 %v638_v37 }
 0x4d6   :  { %v913_v39 = vpop.eup %912 }
 0x4d7   :  { %v640_v41 = vadd.f32 1.0, %v913_v39 }
 0x4d9   :  { %v641_v42 = vmul.f32 %v640_v41, %v637_v40 }
 0x4db   :  { %v642_v43 = vadd.f32 %v641_v42, %v522_v31 }
 0x4dd   :  { %643 = vst.msk [vmem:[#allocation7] sm:$0xff] %vm43_vm1, %v642_v43 }
 0x4de   :  { %969 = shalt.err (!%p966_p6)
}
 0x4df   :  { %s970_s23 = scalar_lea.hbm %s1128_s3, 128 }
 0x4e0   :  { %p971_p7 = scmp.ne.s32.totalorder %s1128_s3, %s970_s23  ;;  %p974_p8 = scmp.lt.u32.totalorder %s970_s23, %s1128_s3 }
 0x4e2   :  { %p976_p9 = pnand %p974_p8, %p971_p7 }
 0x4e4   :  { %979 = shalt.err (!%p976_p9)
}
 0x4e5   :  { %653 = dma.vmem_to_hbm [thread:$0]  %s651_s20, 128, %s1128_s3, [#allocation4]  }
 0x4e6   :  { %984 = dma.done.wait [#allocation4], 128  }
 0x4e7   :  { %985 = vsyncadd [#allocation4], 4294967168 }
 0x4e8   :  { %657 = vsyncpa [#allocation3], 1 }
 0x4e9   :  { %658 = vsyncpa [#allocation6], 1 }
 0x4ea   :  { %659 = vsyncpa [#allocation4], 1 }

</bundles_post_ra>
